<compile_context>
chip_gen: v6e
topology: v6e:2x2x1
jax: 0.10.0
libtpu: 0.0.40
codegen_flags: <defaults>
</compile_context>

<pallas_src>
import functools

import jax
import jax.numpy as jnp
from jax import lax
from jax.experimental import pallas as pl
from jax.experimental.pallas import tpu as pltpu


def _round_up(n, m):
    return ((n + m - 1) // m) * m


def _mamlpp_kernel(x_ref, y_ref, w_ref, b_ref,
                   w_out_ref, b_out_ref, logits_out_ref,
                   *, steps, eff_lr, num_classes, c8):
    """Inner-loop SGD adaptation of a linear classifier under softmax-CE loss.

    One grid step == TT MAML tasks.

    x_ref          : (TT, B, D)   f32  adaptation inputs
    y_ref          : (TT, B, 1)   i32  integer labels
    w_ref          : (CP, D)      f32  initial Linear weight (rows >= C zero)
    b_ref          : (1, CP)      f32  initial Linear bias   (cols >= C zero)
    w_out_ref      : (TT, C8, D)  f32  adapted weight (only first C8 rows kept)
    b_out_ref      : (TT, 1, CP)  f32  adapted bias
    logits_out_ref : (TT, B, CP)  f32  logits of the adapted model on x
    """
    TT, B, D = x_ref.shape
    CP = b_ref.shape[1]

    w0 = w_ref[...]          # (CP, D)   shared meta-init, loaded once per block
    b0 = b_ref[...]          # (1, CP)

    # Padded-class mask as a single (1, CP) row, fused with the bias inside the
    # loop. Padded logits -> -1e30 -> softmax prob exactly 0, so their gradient
    # rows/cols stay exactly zero (needed for the narrow C8-row W output).
    col_row = lax.broadcasted_iota(jnp.int32, (1, CP), 1)
    mask_row = jnp.where(col_row < num_classes,
                         jnp.float32(0.0), jnp.float32(-1e30))       # (1, CP)

    # (B, D) . (CP, D) contracting D  -> (B, CP)    (no W transpose)
    dn_fwd = (((1,), (1,)), ((), ()))
    # (B, CP) . (B, D) contracting B  -> (CP, D)    (no dlogits transpose)
    dn_grad = (((0,), (0,)), ((), ()))

    col_b = lax.broadcasted_iota(jnp.int32, (B, CP), 1)               # hoisted

    @pl.loop(0, TT)
    def _per_task(tt):
        x = x_ref[tt]                                     # (B, D)
        y = y_ref[tt]                                     # (B, 1) int32
        # One-hot built in-kernel (labels < C, so padded columns are 0).
        yh = (col_b == y).astype(jnp.float32)             # (B, CP)

        def sgd_step(_, carry):
            W, b = carry
            logits = lax.dot_general(
                x, W, dn_fwd, preferred_element_type=jnp.float32) + (b + mask_row)
            # numerically stable softmax
            m = jnp.max(logits, axis=-1, keepdims=True)
            e = jnp.exp(logits - m)
            p = e * pl.reciprocal(jnp.sum(e, axis=-1, keepdims=True), approx=False)
            # dL/dlogits for CrossEntropyLoss; the 1/B of reduction='mean' is
            # folded into eff_lr.
            dlogits = p - yh                                           # (B, CP)
            dW = lax.dot_general(dlogits, x, dn_grad,
                                 preferred_element_type=jnp.float32)  # (CP, D)
            db = jnp.sum(dlogits, axis=0, keepdims=True)               # (1, CP)
            # SGD update (momentum=0 inside GDLearner)
            return (W - eff_lr * dW, b - eff_lr * db)

        # unroll=True is right while (steps, D) are small; for bigger configs
        # switch to unroll=False or hold W in VMEM scratch to bound live ranges.
        W, b = lax.fori_loop(0, steps, sgd_step, (w0, b0), unroll=True)

        # Only the first C8 (= round_up(C, 8)) sublane rows of W are real;
        # padded rows are exactly zero thanks to the class mask.
        w_out_ref[tt] = W[:c8, :]
        b_out_ref[tt] = b
        # Logits of the *adapted* model (no mask; padded columns are exactly 0
        # and the wrapper slices them away).
        logits_out_ref[tt] = lax.dot_general(
            x, W, dn_fwd, preferred_element_type=jnp.float32) + b


def mamlpp_adapt(x, y, W, b, *, steps, lr, tasks_per_block=None):
    """Run the MAMLpp inner loop for a batch of tasks in one Pallas kernel.

    x : (T, B, D) f32  per-task adaptation inputs
    y : (T, B)    int  per-task integer labels
    W : (C, D)    f32  shared initial (meta) Linear weight
    b : (1, C)    f32  shared initial (meta) Linear bias
    Returns (W_adapted (T, C, D), b_adapted (T, 1, C), logits (T, B, C)).
    """
    T, B, D = x.shape
    C = W.shape[0]
    CP = _round_up(C, 128)   # lane-dense class dim (logits / bias / compute)
    C8 = _round_up(C, 8)     # sublane-aligned class dim (adapted-W output)

    if tasks_per_block is None:
        # Two grid steps when possible so v7x megacore gets both TCs busy;
        # otherwise one big block (the right call on single-TC v5e/v6e).
        tasks_per_block = T // 2 if (T >= 2 and T % 2 == 0) else T
    TT = tasks_per_block
    assert T % TT == 0, "T must be divisible by tasks_per_block"
    n_blocks = T // TT

    y3 = y.astype(jnp.int32).reshape(T, B, 1)
    W_p = jnp.zeros((CP, D), jnp.float32).at[:C, :].set(W)
    b_p = jnp.zeros((1, CP), jnp.float32).at[:, :C].set(b)

    kernel = functools.partial(_mamlpp_kernel, steps=steps, eff_lr=lr / B,
                               num_classes=C, c8=C8)

    Wa, ba, logits_p = pl.pallas_call(
        kernel,
        grid=(n_blocks,),
        in_specs=[
            pl.BlockSpec((TT, B, D), lambda t: (t, 0, 0)),    # x       (per block)
            pl.BlockSpec((TT, B, 1), lambda t: (t, 0, 0)),    # labels  (per block)
            pl.BlockSpec((CP, D), lambda t: (0, 0)),          # W0      (shared)
            pl.BlockSpec((1, CP), lambda t: (0, 0)),          # b0      (shared)
        ],
        out_specs=(
            pl.BlockSpec((TT, C8, D), lambda t: (t, 0, 0)),   # adapted W (narrow)
            pl.BlockSpec((TT, 1, CP), lambda t: (t, 0, 0)),   # adapted b
            pl.BlockSpec((TT, B, CP), lambda t: (t, 0, 0)),   # adapted logits
        ),
        out_shape=(
            jax.ShapeDtypeStruct((T, C8, D), jnp.float32),
            jax.ShapeDtypeStruct((T, 1, CP), jnp.float32),
            jax.ShapeDtypeStruct((T, B, CP), jnp.float32),
        ),
        compiler_params=pltpu.CompilerParams(
            dimension_semantics=("parallel",)),
    )(x, y3, W_p, b_p)

    return Wa[:, :C, :], ba[:, :, :C], logits_p[:, :, :C]


def mamlpp_reference(x, y, W0, b0, *, steps, lr, num_classes):
    """Pure-JAX reference of the same per-task inner loop (correctness check)."""
    y1 = jax.nn.one_hot(y, num_classes, dtype=jnp.float32)

    def one_task(xt, yt):
        B = xt.shape[0]
        W, b = W0, b0
        for _ in range(steps):
            logits = xt @ W.T + b
            p = jax.nn.softmax(logits, axis=-1)
            dl = (p - yt) / B
            W = W - lr * (dl.T @ xt)
            b = b - lr * jnp.sum(dl, axis=0, keepdims=True)
        return W, b, xt @ W.T + b

    return jax.vmap(one_task)(x, y1)


if __name__ == "__main__":
    # Small, TPU-friendly shapes consistent with a linear inner model,
    # batched over T MAML tasks.
    T, B, D, C = 4, 8, 128, 8
    STEPS = 3          # steps_eval
    LR = 0.1

    key = jax.random.PRNGKey(0)
    kx, ky, kw, kb = jax.random.split(key, 4)

    x = jax.random.normal(kx, (T, B, D), dtype=jnp.float32)
    y = jax.random.randint(ky, (T, B), 0, C, dtype=jnp.int32)

    # Deterministic init of the inner Linear(D, C): weight (C, D), bias (1, C).
    W0 = jax.random.normal(kw, (C, D), dtype=jnp.float32) * (1.0 / jnp.sqrt(D))
    b0 = jax.random.normal(kb, (1, C), dtype=jnp.float32) * 0.01

    W_a, b_a, logits_a = mamlpp_adapt(x, y, W0, b0, steps=STEPS, lr=LR)
    jax.block_until_ready((W_a, b_a, logits_a))

    W_r, b_r, logits_r = mamlpp_reference(x, y, W0, b0, steps=STEPS, lr=LR,
                                          num_classes=C)
    assert jnp.allclose(W_a, W_r, atol=1e-4, rtol=1e-4)
    assert jnp.allclose(b_a, b_r, atol=1e-4, rtol=1e-4)
    assert jnp.allclose(logits_a, logits_r, atol=1e-4, rtol=1e-4)

    print("KERNEL_OK")
</pallas_src>

<mosaic_0001>
module attributes {stable_mosaic.version = 11 : i64} {
  func.func @_mamlpp_kernel(%arg0: i32, %arg1: memref<2x8x128xf32, #tpu.memory_space<vmem>>, %arg2: memref<2x8x1xi32, #tpu.memory_space<vmem>>, %arg3: memref<128x128xf32, #tpu.memory_space<vmem>>, %arg4: memref<1x128xf32, #tpu.memory_space<vmem>>, %arg5: memref<2x8x128xf32, #tpu.memory_space<vmem>>, %arg6: memref<2x1x128xf32, #tpu.memory_space<vmem>>, %arg7: memref<2x8x128xf32, #tpu.memory_space<vmem>>) attributes {dimension_semantics = [#tpu.dimension_semantics<parallel>], iteration_bounds = array<i64: 2>, scalar_prefetch = 0 : i64, scratch_operands = 0 : i64, tpu.core_type = #tpu.core_type<tc>, window_params = [{transform_indices = @transform_0, window_bounds = array<i64: 2, 8, 128>}, {transform_indices = @transform_1, window_bounds = array<i64: 2, 8, 1>}, {pipeline_mode = #tpu.pipeline_mode<synchronous>, transform_indices = @transform_2, window_bounds = array<i64: 128, 128>}, {pipeline_mode = #tpu.pipeline_mode<synchronous>, transform_indices = @transform_3, window_bounds = array<i64: 1, 128>}, {transform_indices = @transform_4, window_bounds = array<i64: 2, 8, 128>}, {transform_indices = @transform_5, window_bounds = array<i64: 2, 1, 128>}, {transform_indices = @transform_6, window_bounds = array<i64: 2, 8, 128>}]} {
    %c0 = arith.constant 0 : index
    %c0_0 = arith.constant 0 : index
    %0 = vector.load %arg3[%c0, %c0_0] : memref<128x128xf32, #tpu.memory_space<vmem>>, vector<128x128xf32>
    %c0_1 = arith.constant 0 : index
    %c0_2 = arith.constant 0 : index
    %1 = vector.load %arg4[%c0_1, %c0_2] : memref<1x128xf32, #tpu.memory_space<vmem>>, vector<1x128xf32>
    %2 = tpu.iota {dimensions = array<i32: 1>} : vector<1x128xi32>
    %c8_i32 = arith.constant 8 : i32
    %3 = vector.broadcast %c8_i32 : i32 to vector<1x128xi32>
    %4 = arith.cmpi slt, %2, %3 : vector<1x128xi32>
    %cst = arith.constant 0.000000e+00 : f32
    %cst_3 = arith.constant -1.000000e+30 : f32
    %5 = vector.broadcast %cst : f32 to vector<1x128xf32>
    %6 = vector.broadcast %cst_3 : f32 to vector<1x128xf32>
    %7 = arith.select %4, %5, %6 : vector<1x128xi1>, vector<1x128xf32>
    %8 = tpu.iota {dimensions = array<i32: 1>} : vector<8x128xi32>
    %c0_i32 = arith.constant 0 : i32
    %c2_i32 = arith.constant 2 : i32
    %9 = arith.addi %c0_i32, %c2_i32 : i32
    %c1_i32 = arith.constant 1 : i32
    scf.for %arg8 = %c0_i32 to %9 step %c1_i32  : i32 {
      %c1_i32_5 = arith.constant 1 : i32
      %10 = arith.muli %arg8, %c1_i32_5 : i32
      %c0_i32_6 = arith.constant 0 : i32
      %11 = arith.addi %c0_i32_6, %10 : i32
      %12 = arith.index_cast %11 : i32 to index
      %c0_7 = arith.constant 0 : index
      %c0_8 = arith.constant 0 : index
      %13 = vector.load %arg1[%12, %c0_7, %c0_8] : memref<2x8x128xf32, #tpu.memory_space<vmem>>, vector<1x8x128xf32>
      %14 = vector.shape_cast %13 : vector<1x8x128xf32> to vector<8x128xf32>
      %15 = arith.index_cast %11 : i32 to index
      %c0_9 = arith.constant 0 : index
      %c0_10 = arith.constant 0 : index
      %16 = vector.load %arg2[%15, %c0_9, %c0_10] : memref<2x8x1xi32, #tpu.memory_space<vmem>>, vector<1x8x1xi32>
      %17 = vector.shape_cast %16 : vector<1x8x1xi32> to vector<8x1xi32>
      %18 = vector.broadcast %17 : vector<8x1xi32> to vector<8x128xi32>
      %19 = arith.cmpi eq, %8, %18 : vector<8x128xi32>
      %20 = arith.extui %19 : vector<8x128xi1> to vector<8x128xi32>
      %21 = arith.sitofp %20 : vector<8x128xi32> to vector<8x128xf32>
      %c0_i32_11 = arith.constant 0 : i32
      %cst_12 = arith.constant dense<0.000000e+00> : vector<8x128xf32>
      %22 = tpu.matmul %14, %0, %cst_12 {dimension_numbers = #tpu.dot_dimension_numbers<[1], [1], [0], [0], [0, 0, 1, 0], [], []>} : vector<8x128xf32>, vector<128x128xf32>, vector<8x128xf32> -> vector<8x128xf32>
      %23 = arith.addf %1, %7 : vector<1x128xf32>
      %24 = vector.broadcast %23 : vector<1x128xf32> to vector<8x128xf32>
      %25 = arith.addf %22, %24 : vector<8x128xf32>
      %cst_13 = arith.constant dense<0xFF800000> : vector<8xf32>
      %26 = vector.multi_reduction <maximumf>, %25, %cst_13 [1] : vector<8x128xf32> to vector<8xf32>
      %27 = vector.shape_cast %26 : vector<8xf32> to vector<8x1xf32>
      %28 = vector.broadcast %27 : vector<8x1xf32> to vector<8x128xf32>
      %29 = arith.subf %25, %28 : vector<8x128xf32>
      %30 = math.exp %29 : vector<8x128xf32>
      %cst_14 = arith.constant dense<0.000000e+00> : vector<8xf32>
      %31 = vector.multi_reduction <add>, %30, %cst_14 [1] : vector<8x128xf32> to vector<8xf32>
      %32 = vector.shape_cast %31 : vector<8xf32> to vector<8x1xf32>
      %33 = tpu.reciprocal %32 : vector<8x1xf32> -> vector<8x1xf32>
      %34 = vector.broadcast %33 : vector<8x1xf32> to vector<8x128xf32>
      %35 = arith.mulf %30, %34 : vector<8x128xf32>
      %36 = arith.subf %35, %21 : vector<8x128xf32>
      %cst_15 = arith.constant dense<0.000000e+00> : vector<128x128xf32>
      %37 = tpu.matmul %36, %14, %cst_15 {dimension_numbers = #tpu.dot_dimension_numbers<[0], [0], [1], [1], [0, 1, 1, 1], [], []>} : vector<8x128xf32>, vector<8x128xf32>, vector<128x128xf32> -> vector<128x128xf32>
      %cst_16 = arith.constant dense<0.000000e+00> : vector<128xf32>
      %38 = vector.multi_reduction <add>, %36, %cst_16 [0] : vector<8x128xf32> to vector<128xf32>
      %39 = vector.shape_cast %38 : vector<128xf32> to vector<1x128xf32>
      %cst_17 = arith.constant 1.250000e-02 : f32
      %40 = vector.broadcast %cst_17 : f32 to vector<128x128xf32>
      %41 = arith.mulf %40, %37 : vector<128x128xf32>
      %42 = arith.subf %0, %41 : vector<128x128xf32>
      %cst_18 = arith.constant 1.250000e-02 : f32
      %43 = vector.broadcast %cst_18 : f32 to vector<1x128xf32>
      %44 = arith.mulf %43, %39 : vector<1x128xf32>
      %45 = arith.subf %1, %44 : vector<1x128xf32>
      %c1_i32_19 = arith.constant 1 : i32
      %cst_20 = arith.constant dense<0.000000e+00> : vector<8x128xf32>
      %46 = tpu.matmul %14, %42, %cst_20 {dimension_numbers = #tpu.dot_dimension_numbers<[1], [1], [0], [0], [0, 0, 1, 0], [], []>} : vector<8x128xf32>, vector<128x128xf32>, vector<8x128xf32> -> vector<8x128xf32>
      %47 = arith.addf %45, %7 : vector<1x128xf32>
      %48 = vector.broadcast %47 : vector<1x128xf32> to vector<8x128xf32>
      %49 = arith.addf %46, %48 : vector<8x128xf32>
      %cst_21 = arith.constant dense<0xFF800000> : vector<8xf32>
      %50 = vector.multi_reduction <maximumf>, %49, %cst_21 [1] : vector<8x128xf32> to vector<8xf32>
      %51 = vector.shape_cast %50 : vector<8xf32> to vector<8x1xf32>
      %52 = vector.broadcast %51 : vector<8x1xf32> to vector<8x128xf32>
      %53 = arith.subf %49, %52 : vector<8x128xf32>
      %54 = math.exp %53 : vector<8x128xf32>
      %cst_22 = arith.constant dense<0.000000e+00> : vector<8xf32>
      %55 = vector.multi_reduction <add>, %54, %cst_22 [1] : vector<8x128xf32> to vector<8xf32>
      %56 = vector.shape_cast %55 : vector<8xf32> to vector<8x1xf32>
      %57 = tpu.reciprocal %56 : vector<8x1xf32> -> vector<8x1xf32>
      %58 = vector.broadcast %57 : vector<8x1xf32> to vector<8x128xf32>
      %59 = arith.mulf %54, %58 : vector<8x128xf32>
      %60 = arith.subf %59, %21 : vector<8x128xf32>
      %cst_23 = arith.constant dense<0.000000e+00> : vector<128x128xf32>
      %61 = tpu.matmul %60, %14, %cst_23 {dimension_numbers = #tpu.dot_dimension_numbers<[0], [0], [1], [1], [0, 1, 1, 1], [], []>} : vector<8x128xf32>, vector<8x128xf32>, vector<128x128xf32> -> vector<128x128xf32>
      %cst_24 = arith.constant dense<0.000000e+00> : vector<128xf32>
      %62 = vector.multi_reduction <add>, %60, %cst_24 [0] : vector<8x128xf32> to vector<128xf32>
      %63 = vector.shape_cast %62 : vector<128xf32> to vector<1x128xf32>
      %cst_25 = arith.constant 1.250000e-02 : f32
      %64 = vector.broadcast %cst_25 : f32 to vector<128x128xf32>
      %65 = arith.mulf %64, %61 : vector<128x128xf32>
      %66 = arith.subf %42, %65 : vector<128x128xf32>
      %cst_26 = arith.constant 1.250000e-02 : f32
      %67 = vector.broadcast %cst_26 : f32 to vector<1x128xf32>
      %68 = arith.mulf %67, %63 : vector<1x128xf32>
      %69 = arith.subf %45, %68 : vector<1x128xf32>
      %c2_i32_27 = arith.constant 2 : i32
      %cst_28 = arith.constant dense<0.000000e+00> : vector<8x128xf32>
      %70 = tpu.matmul %14, %66, %cst_28 {dimension_numbers = #tpu.dot_dimension_numbers<[1], [1], [0], [0], [0, 0, 1, 0], [], []>} : vector<8x128xf32>, vector<128x128xf32>, vector<8x128xf32> -> vector<8x128xf32>
      %71 = arith.addf %69, %7 : vector<1x128xf32>
      %72 = vector.broadcast %71 : vector<1x128xf32> to vector<8x128xf32>
      %73 = arith.addf %70, %72 : vector<8x128xf32>
      %cst_29 = arith.constant dense<0xFF800000> : vector<8xf32>
      %74 = vector.multi_reduction <maximumf>, %73, %cst_29 [1] : vector<8x128xf32> to vector<8xf32>
      %75 = vector.shape_cast %74 : vector<8xf32> to vector<8x1xf32>
      %76 = vector.broadcast %75 : vector<8x1xf32> to vector<8x128xf32>
      %77 = arith.subf %73, %76 : vector<8x128xf32>
      %78 = math.exp %77 : vector<8x128xf32>
      %cst_30 = arith.constant dense<0.000000e+00> : vector<8xf32>
      %79 = vector.multi_reduction <add>, %78, %cst_30 [1] : vector<8x128xf32> to vector<8xf32>
      %80 = vector.shape_cast %79 : vector<8xf32> to vector<8x1xf32>
      %81 = tpu.reciprocal %80 : vector<8x1xf32> -> vector<8x1xf32>
      %82 = vector.broadcast %81 : vector<8x1xf32> to vector<8x128xf32>
      %83 = arith.mulf %78, %82 : vector<8x128xf32>
      %84 = arith.subf %83, %21 : vector<8x128xf32>
      %cst_31 = arith.constant dense<0.000000e+00> : vector<128x128xf32>
      %85 = tpu.matmul %84, %14, %cst_31 {dimension_numbers = #tpu.dot_dimension_numbers<[0], [0], [1], [1], [0, 1, 1, 1], [], []>} : vector<8x128xf32>, vector<8x128xf32>, vector<128x128xf32> -> vector<128x128xf32>
      %cst_32 = arith.constant dense<0.000000e+00> : vector<128xf32>
      %86 = vector.multi_reduction <add>, %84, %cst_32 [0] : vector<8x128xf32> to vector<128xf32>
      %87 = vector.shape_cast %86 : vector<128xf32> to vector<1x128xf32>
      %cst_33 = arith.constant 1.250000e-02 : f32
      %88 = vector.broadcast %cst_33 : f32 to vector<128x128xf32>
      %89 = arith.mulf %88, %85 : vector<128x128xf32>
      %90 = arith.subf %66, %89 : vector<128x128xf32>
      %cst_34 = arith.constant 1.250000e-02 : f32
      %91 = vector.broadcast %cst_34 : f32 to vector<1x128xf32>
      %92 = arith.mulf %91, %87 : vector<1x128xf32>
      %93 = arith.subf %69, %92 : vector<1x128xf32>
      %94 = vector.extract_strided_slice %90 {offsets = [0, 0], sizes = [8, 128], strides = [1, 1]} : vector<128x128xf32> to vector<8x128xf32>
      %95 = arith.index_cast %11 : i32 to index
      %c0_35 = arith.constant 0 : index
      %c0_36 = arith.constant 0 : index
      %96 = vector.load %arg5[%95, %c0_35, %c0_36] : memref<2x8x128xf32, #tpu.memory_space<vmem>>, vector<1x8x128xf32>
      %97 = vector.shape_cast %96 : vector<1x8x128xf32> to vector<8x128xf32>
      %98 = vector.shape_cast %94 : vector<8x128xf32> to vector<1x8x128xf32>
      tpu.vector_store %arg5[%95, %c0_35, %c0_36], %98 {strides = array<i32>} : memref<2x8x128xf32, #tpu.memory_space<vmem>>, vector<1x8x128xf32>,
      %99 = arith.index_cast %11 : i32 to index
      %c0_37 = arith.constant 0 : index
      %c0_38 = arith.constant 0 : index
      %100 = vector.load %arg6[%99, %c0_37, %c0_38] : memref<2x1x128xf32, #tpu.memory_space<vmem>>, vector<1x1x128xf32>
      %101 = vector.shape_cast %100 : vector<1x1x128xf32> to vector<1x128xf32>
      %102 = vector.shape_cast %93 : vector<1x128xf32> to vector<1x1x128xf32>
      tpu.vector_store %arg6[%99, %c0_37, %c0_38], %102 {strides = array<i32>} : memref<2x1x128xf32, #tpu.memory_space<vmem>>, vector<1x1x128xf32>,
      %cst_39 = arith.constant dense<0.000000e+00> : vector<8x128xf32>
      %103 = tpu.matmul %14, %90, %cst_39 {dimension_numbers = #tpu.dot_dimension_numbers<[1], [1], [0], [0], [0, 0, 1, 0], [], []>} : vector<8x128xf32>, vector<128x128xf32>, vector<8x128xf32> -> vector<8x128xf32>
      %104 = vector.broadcast %93 : vector<1x128xf32> to vector<8x128xf32>
      %105 = arith.addf %103, %104 : vector<8x128xf32>
      %106 = arith.index_cast %11 : i32 to index
      %c0_40 = arith.constant 0 : index
      %c0_41 = arith.constant 0 : index
      %107 = vector.load %arg7[%106, %c0_40, %c0_41] : memref<2x8x128xf32, #tpu.memory_space<vmem>>, vector<1x8x128xf32>
      %108 = vector.shape_cast %107 : vector<1x8x128xf32> to vector<8x128xf32>
      %109 = vector.shape_cast %105 : vector<8x128xf32> to vector<1x8x128xf32>
      tpu.vector_store %arg7[%106, %c0_40, %c0_41], %109 {strides = array<i32>} : memref<2x8x128xf32, #tpu.memory_space<vmem>>, vector<1x8x128xf32>,
    }
    %c2_i32_4 = arith.constant 2 : i32
    return
  }
  func.func @transform_0(%arg0: i32) -> (i32, i32, i32) {
    %c0_i32 = arith.constant 0 : i32
    %c0_i32_0 = arith.constant 0 : i32
    %c0_i32_1 = arith.constant 0 : i32
    return %arg0, %c0_i32, %c0_i32_0 : i32, i32, i32
  }
  func.func @transform_1(%arg0: i32) -> (i32, i32, i32) {
    %c0_i32 = arith.constant 0 : i32
    %c0_i32_0 = arith.constant 0 : i32
    %c0_i32_1 = arith.constant 0 : i32
    return %arg0, %c0_i32, %c0_i32_0 : i32, i32, i32
  }
  func.func @transform_2(%arg0: i32) -> (i32, i32) {
    %c0_i32 = arith.constant 0 : i32
    %c0_i32_0 = arith.constant 0 : i32
    %c0_i32_1 = arith.constant 0 : i32
    return %c0_i32, %c0_i32_0 : i32, i32
  }
  func.func @transform_3(%arg0: i32) -> (i32, i32) {
    %c0_i32 = arith.constant 0 : i32
    %c0_i32_0 = arith.constant 0 : i32
    %c0_i32_1 = arith.constant 0 : i32
    return %c0_i32, %c0_i32_0 : i32, i32
  }
  func.func @transform_4(%arg0: i32) -> (i32, i32, i32) {
    %c0_i32 = arith.constant 0 : i32
    %c0_i32_0 = arith.constant 0 : i32
    %c0_i32_1 = arith.constant 0 : i32
    return %arg0, %c0_i32, %c0_i32_0 : i32, i32, i32
  }
  func.func @transform_5(%arg0: i32) -> (i32, i32, i32) {
    %c0_i32 = arith.constant 0 : i32
    %c0_i32_0 = arith.constant 0 : i32
    %c0_i32_1 = arith.constant 0 : i32
    return %arg0, %c0_i32, %c0_i32_0 : i32, i32, i32
  }
  func.func @transform_6(%arg0: i32) -> (i32, i32, i32) {
    %c0_i32 = arith.constant 0 : i32
    %c0_i32_0 = arith.constant 0 : i32
    %c0_i32_1 = arith.constant 0 : i32
    return %arg0, %c0_i32, %c0_i32_0 : i32, i32, i32
  }
}

</mosaic_0001>

<bundles_post_ra>
// kernel: tpu_custom_call.1
= control target key start
LH: loop header
LB: loop body
LE: loop exit
PB: predicated region body
PF: predicated region fallthrough
CT: control target
= control target key end

     0   :  { %s3045_s0 = inlined_call_operand.vmem [shape: f32[4,8,128], index: 0, kind: input, shape index: {}]   ;;  %s3046_s1 = inlined_call_operand.vmem [shape: s32[4,8,1], index: 1, kind: input, shape index: {}]   ;;  %s3047_s2 = inlined_call_operand.hbm [shape: f32[128,128], index: 2, kind: input, shape index: {}]   ;;  %s3048_s3 = inlined_call_operand.vmem [shape: f32[1,128], index: 3, kind: input, shape index: {}]   ;;  %s3049_s4 = inlined_call_operand.hbm [shape: f32[4,8,128], index: 4, kind: output, shape index: {0}]   ;;  %s3050_s5 = inlined_call_operand.hbm [shape: f32[4,1,128], index: 5, kind: output, shape index: {1}]   ;;  %s3051_s6 = inlined_call_operand.hbm [shape: f32[4,8,128], index: 6, kind: output, shape index: {2}]  }
   0x1   :  { %3053 = sst [smem:[#allocation12_spill]] %s3045_s0 }
   0x2   :  { %3054 = sst [smem:[#allocation13_spill]] %s3046_s1 }
   0x3   :  { %3055 = sst [smem:[#allocation14_spill]] %s3047_s2 }
   0x4   :  { %12 = vsyncpa [#allocation3], 0 }
   0x5   :  { %13 = vsyncpa [#allocation4], 0 }
   0x6   :  { %15 = vsyncpa [#allocation4 + $0x1], 0 }
   0x7   :  { %16 = vsyncpa [#allocation7], 0 }
   0x8   :  { %18 = vsyncpa [#allocation7 + $0x1], 0  ;;  %s2415_s21 = smov 0   ;;  %s2417_s22 = smov 0  }
   0x9   :  { %s2419_s23 = smov 0   ;;  %s2421_s24 = smov 0  }
   0xa LB: > { %s2436_s25 = sadd.s32 4294967295, %s2360_s24   ;;  %s3052_s26 = sadd.s32 4294967294, %s2360_s24   ;;  %s2360_s24 = sphi %s2421_s24, %s3067_s24   ;;  %s2356_s23 = sphi %s2419_s23, %s3066_s23   ;;  %s2352_s22 = sphi %s2417_s22, %s3065_s22   ;;  %s2348_s21 = sphi %s2415_s21, %s3064_s21  }
   0xb   : > { %s2440_s27 = sadd.s32 1, %s2360_s24   ;;  %s125_s28 = sadd.s32 1, %s2356_s23 }
   0xc   : > { %s122_s29 = ssub.s32 %s2360_s24, %s2440_s27  ;;  %p135_p0 = scmp.ne.s32.totalorder %s2356_s23, %s2352_s22 }
   0xd   : > { %p123_p1 = scmp.eq.s32.totalorder %s122_s29, 0  ;;  %p136_p2 = scmp.eq.s32.totalorder %s2436_s25, 1 }
   0xe   : > { %p141_p3 = scmp.ne.s32.totalorder %s2352_s22, %s2348_s21  ;;  %p142_p4 = scmp.eq.s32.totalorder %s3052_s26, 1 }
   0xf   : > { %s2453_s30 = scalar_select %p123_p1, %s2356_s23, %s125_s28  }
  0x10   : > { %p2455_p5 = por %p136_p2, %p135_p0  ;;  %p2459_p6 = por %p142_p4, %p141_p3 }
  0x11   : > { %p1705_p7 = scmp.ge.s32.totalorder %s2360_s24, 1  ;;  %p201_p8 = scmp.lt.s32.totalorder %s2360_s24, 3 }
  0x12   : > { %s3057_s8 = scalar_select %p2459_p6, 1, 0 }
  0x13   : > { %p2142_p9 = scmp.eq.s32.totalorder %s2436_s25, 0  ;;  %p2466_p10 = pnand %p1705_p7, %p201_p8 }
  0x14   : > { %s2366_s10 = smov [#allocation2]  }
  0x15   : > { %s213_s11 = sshll.u32 %s2366_s10, 4  ;;  %p2128_p11 = pneg %p2466_p10  ;;  %s214_s11 = int_to_ptr.vmem [resolvable:$true] %s213_s11 }
  0x16   : > { %s2221_s12 = scalar_lea.vmem %s214_s11, 2048  ;;  %p2229_p3 = scmp.lt.s32.totalorder %s214_s11, %s214_s11 }
  0x17   : > { %p2129_p12 = pnand %p2142_p9, %p2128_p11  ;;  %p2222_p0 = scmp.ne.s32.totalorder %s214_s11, %s2221_s12 }
  0x18   : > { %p2230_p4 = scmp.lt.s32.totalorder %s2221_s12, %s2221_s12 }
  0x19   : > { %p2212_p13 = pneg %p2129_p12 }
  0x1a   : > { %p2231_p6 = por %p2230_p4, %p2229_p3 }
  0x1b   : > { %p2224_p1 = pnand %p2222_p0, %p2212_p13 }
  0x1d   : > { %p2225_p2 = pneg %p2224_p1 }
  0x1f   : > { %p2232_p7 = pnand %p2231_p6, %p2225_p2 }
  0x21   : > { %2235 = shalt.err (!%p2232_p7)
}
  0x22   : > { %s2367_s13 = smov 128   ;;  %s2368_s14 = smov 8  }
  0x23   : > { %s3059_s2 = sld [smem:[#allocation14_spill]] }
  0x25   : > { %250 = sbr.rel (%p2466_p10) target bundleno = 3230 (0xc9e), region = 36 }
  0x29   : > { %2131 = dma.hbm_to_vmem [thread:$0]  (!%p2129_p12), %s3059_s2, 2048, %s214_s11, [#allocation3], %s2367_s13, %s2367_s13, %s2368_s14  }
  0x2a   : > { %2335 = dma.done.wait (%p2142_p9), [#allocation3], 2048  }
  0x2b   : > { %2337 = vsyncadd (%p2142_p9), [#allocation3], 4294965248  ;;  %s2484_s17 = sand.u32 1, %s2352_s22   ;;  %s1713_s18 = sshll.u32 %s2436_s25, 1  ;;  %v327_v0 = vlaneseq  ;;  %v2369_v2 = vmov -1e+30  }
  0x2c   : > { %s1710_s19 = sshll.u32 %s2484_s17, 4  ;;  %s1711_s20 = sshll.u32 %s2484_s17, 1  ;;  %v2495_v4 = vld [vmem:[#allocation2] sm:$0xff]  ;;  %v2497_v5 = vld [vmem:[#allocation2 + $0x8] sm:$0xff]  ;;  %v2499_v6 = vld [vmem:[#allocation2 + $0x10] sm:$0xff] }
  0x2d   : > { %v2490_v1 = vand.u32 127, %v327_v0  ;;  %p296_p6 = scmp.lt.s32.totalorder %s1713_s18, 3  ;;  %v2501_v7 = vld [vmem:[#allocation2 + $0x18] sm:$0xff]  ;;  %v2503_v8 = vld [vmem:[#allocation2 + $0x20] sm:$0xff]  ;;  %v2505_v9 = vld [vmem:[#allocation2 + $0x28] sm:$0xff]  ;;  %s3060_s0 = sld [smem:[#allocation12_spill]] }
  0x2e   : > { %s3061_s1 = sld [smem:[#allocation13_spill]]  ;;  %v2517_v10 = vld [vmem:[#allocation2 + $0x30] sm:$0xff]  ;;  %v2519_v11 = vld [vmem:[#allocation2 + $0x38] sm:$0xff]  ;;  %v2521_v12 = vld [vmem:[#allocation2 + $0x40] sm:$0xff]  ;;  %s2544_s16 = scalar_lea.vmem [#allocation5], %s1710_s19 }
  0x2f   : > { %vm329_vm0 = vcmp.lt.s32.totalorder %v2490_v1, 8  ;;  %s3069_s18 = smov (!%p296_p6, %s1713_s18), 3  ;;  %v2523_v13 = vld [vmem:[#allocation2 + $0x48] sm:$0xff]  ;;  %v2525_v14 = vld [vmem:[#allocation2 + $0x50] sm:$0xff]  ;;  %v2527_v15 = vld [vmem:[#allocation2 + $0x58] sm:$0xff]  ;;  %s2552_s29 = smov 0  }
  0x30   : > { %v2493_v3 = vsel %vm329_vm0, 0.0, %v2369_v2  ;;  %s1714_s28 = sshll.u32 %s3069_s18, 3  ;;  %v2529_v16 = vld [vmem:[#allocation2 + $0x60] sm:$0xff]  ;;  %v2531_v17 = vld [vmem:[#allocation2 + $0x68] sm:$0xff]  ;;  %v2533_v18 = vld [vmem:[#allocation2 + $0x70] sm:$0xff]  ;;  %s2546_s18 = scalar_lea.vmem [#allocation6], %s1711_s20 }
  0x31   : > { %v2535_v19 = vld [vmem:[#allocation2 + $0x78] sm:$0xff]  ;;  %v2540_v20 = vld [vmem:[%s3048_s3] sm:$0x1] }
  0x33   : > { %s2510_s10 = scalar_lea.vmem %s3060_s0, %s1714_s28 }
  0x34   : > { %s2515_s13 = scalar_lea.vmem %s3061_s1, %s1714_s28  ;;  %s2550_s28 = scalar_lea.vmem [#allocation8], %s1710_s19 }
  0x35 LB: >> { %v2370_v21 = vmov 0.0   ;;  %vm2371_vm1 = vmmov 0   ;;  %s2562_s19 = sshll.u32 %s2364_s29, 3  ;;  %v351_v23 = vshrl.u32 %v327_v0, 7  ;;  %v348_v24 = vadd.f32 %v2493_v3, %v2540_v20  ;;  %s1407_s11 = scalar_lea.vmem %s2546_s18, %s2364_s29 [#allocation6]  ;;  %s2364_s29 = sphi %s2552_s29, %s336_s29  }
  0x36   : >> { %1900 = vmatprep.subr.mxu0 %v2370_v21  ;;  %1932 = vmatprep.mubr.msk.f32.mxu0 %vm2371_vm1, %v2370_v21  ;;  %s338_s20 = scalar_lea.vmem %s2510_s10, %s2562_s19  ;;  %s340_s9 = scalar_lea.vmem %s2515_s13, %s2562_s19  ;;  %v2372_v30 = vmov 0   ;;  %vm467_vm3 = vcmask 64512  }
  0x37   : >> { %1901 = vmatpush3.xpose.msra.mxu0 %v2535_v19  ;;  %v2567_v22 = vld [vmem:[%s338_s20] sm:$0xff]  ;;  %v2608_v25 = vsub.s32 0, %v351_v23  ;;  %2196 = vset.pattern.permute.xlu1 %v2372_v30  ;;  %s1405_s12 = scalar_lea.vmem %s2544_s16, %s2562_s19 [#allocation5]  ;;  %s1485_s14 = scalar_lea.vmem %s2550_s28, %s2562_s19 [#allocation8] }
  0x38   : >> { %1902 = vmatprep.subr.mxu0 %v2370_v21  ;;  %1935 = vmatprep.subr.mxu1 %v2567_v22  ;;  %v341_v31 = vld [vmem:[%s340_s9] sm:$0xff]  ;;  %s336_s29 = sadd.s32 1, %s2364_s29  }
  0x39   : >> { %1936 = vmatpush3.msra.mxu1 %v2567_v22  ;;  %v353_v26 = vrot.slane %v348_v24, %v2608_v25  ;;  %343 = vperm.xlu1 %2196, %v341_v31   ;;  %p333_p8 = scmp.ge.s32.totalorder %s336_s29, 2  }
  0x3a   : >> { %1961 = vmatprep.subr.mxu1 %v2370_v21  ;;  %s1492_s15 = sand.u32 (%p333_p8), 1, %s2436_s25   ;;  %s1779_s20 = sshll.u32 (%p333_p8), %s2436_s25, 5 }
  0x3b   : >> { %1903 = vmatpush3.xpose.msra.mxu0 %v2533_v18  ;;  %s1527_s19 = sshll.u32 (%p333_p8), %s2546_s18, 4  ;;  %s2373_s10 = smov (%p333_p8), [#allocation6]   ;;  %s2940_s19 = int_to_ptr.vmem [resolvable:$true] %s1527_s19 }
  0x3c   : >> { %1904 = vmatprep.subr.mxu0 %v2370_v21  ;;  %s2236_s29 = scalar_lea.vmem (%p333_p8), %s2940_s19, 32  ;;  %s2240_s13 = sshll.u32 (%p333_p8), %s2373_s10, 4  ;;  %s2241_s13 = int_to_ptr.vmem [resolvable:$false] %s2240_s13 }
  0x3d   : > { %p2237_p9 = scmp.ne.s32.totalorder (%p333_p8), %s2940_s19, %s2236_s29  ;;  %s2242_s26 = scalar_lea.vmem (%p333_p8), %s2241_s13, 64 }
  0x3e   : > { %p2243_p12 = scmp.lt.s32.totalorder (%p333_p8), %s2940_s19, %s2241_s13  ;;  %p2244_p13 = scmp.lt.s32.totalorder (%p333_p8), %s2242_s26, %s2236_s29 }
  0x3f   : >> { %1905 = vmatpush3.xpose.msra.mxu0 %v2531_v17  ;;  %p2238_p10 = pnand (%p333_p8), %p2237_p9, %p2455_p5 }
  0x40   : >> { %1906 = vmatprep.subr.mxu0 %v2370_v21  ;;  %p2245_p0 = por (%p333_p8), %p2244_p13, %p2243_p12 }
  0x41   : > { %p2239_p11 = pneg (%p333_p8), %p2238_p10 }
  0x43   : >> { %1907 = vmatpush3.xpose.msra.mxu0 %v2529_v16  ;;  %p2246_p1 = pnand (%p333_p8), %p2245_p0, %p2239_p11 }
  0x44   : >> { %1908 = vmatprep.subr.mxu0 %v2370_v21 }
  0x47   : >> { %1909 = vmatpush3.xpose.msra.mxu0 %v2527_v15 }
  0x48   : >> { %1910 = vmatprep.subr.mxu0 %v2370_v21 }
  0x4b   : >> { %1911 = vmatpush3.xpose.msra.mxu0 %v2525_v14 }
  0x4c   : >> { %1912 = vmatprep.subr.mxu0 %v2370_v21 }
  0x4f   : >> { %1913 = vmatpush3.xpose.msra.mxu0 %v2523_v13 }
  0x50   : >> { %1914 = vmatprep.subr.mxu0 %v2370_v21 }
  0x53   : >> { %1915 = vmatpush3.xpose.msra.mxu0 %v2521_v12 }
  0x54   : >> { %1916 = vmatprep.subr.mxu0 %v2370_v21 }
  0x57   : >> { %1917 = vmatpush3.xpose.msra.mxu0 %v2519_v11 }
  0x58   : >> { %1918 = vmatprep.subr.mxu0 %v2370_v21 }
  0x5b   : >> { %1919 = vmatpush3.xpose.msra.mxu0 %v2517_v10 }
  0x5c   : >> { %1920 = vmatprep.subr.mxu0 %v2370_v21 }
  0x5f   : >> { %1921 = vmatpush3.xpose.msra.mxu0 %v2505_v9 }
  0x60   : >> { %1922 = vmatprep.subr.mxu0 %v2370_v21 }
  0x63   : >> { %1923 = vmatpush3.xpose.msra.mxu0 %v2503_v8 }
  0x64   : >> { %1924 = vmatprep.subr.mxu0 %v2370_v21 }
  0x67   : >> { %1925 = vmatpush3.xpose.msra.mxu0 %v2501_v7 }
  0x68   : >> { %1926 = vmatprep.subr.mxu0 %v2370_v21 }
  0x6b   : >> { %1927 = vmatpush3.xpose.msra.mxu0 %v2499_v6 }
  0x6c   : >> { %1928 = vmatprep.subr.mxu0 %v2370_v21 }
  0x6f   : >> { %1929 = vmatpush3.xpose.msra.mxu0 %v2497_v5 }
  0x70   : >> { %1930 = vmatprep.subr.mxu0 %v2370_v21 }
  0x73   : >> { %1931 = vmatpush3.xpose.msra.mxu0 %v2495_v4 }
  0x74   : >> { %2057 = vmatprep.subr.mxu0 %v2567_v22 }
  0x76   : >> { %1933 = vmatmul.mubr.f32.vlgmr.msra.gmra.mxu0 %v2567_v22 }
  0x77   : >> { %2058 = vmatpush3.msra.mxu0 %v2567_v22 }
  0x78   : >> { %2083 = vmatprep.subr.mxu0 %v2370_v21 }
  0xb4   : >> { %v344_v37 = vpop.permute.xlu1 %343 }
  0xb5   : >> { %vm345_vm2 = vcmp.eq.s32.totalorder %v2490_v1, %v344_v37 }
  0xb6   : >> { %v2616_v39 = vsel %vm345_vm2, 1.0, %v2370_v21 }
 0x136   : >> { %v421_v27 = vpop.f32.mrf.mxu0 }
 0x137   : >> { %v422_v28 = vadd.f32 %v421_v27, %v353_v26 }
 0x138   : >> { %v1934_v29 = vpop.f32.mrf.mxu0 }
 0x139   : >> { %425 = vmax.xlane.f32.xlu0 %v422_v28 }
 0x1c2   : >> { %v426_v32 = vpop.xlane.xlu0 %425 }
 0x1c3   : >> { %v427_v33 = vsub.f32 %v422_v28, %v426_v32 }
 0x1c5   : >> { %v428_v34 = vmul.f32 1.442695, %v427_v33 }
 0x1c7   : >> { %2198 = vpow2.f32 %v428_v34 }
 0x1d4   : >> { %v2199_v35 = vpop.eup %2198 }
 0x1d5   : >> { %430 = vadd.xlane.f32.xlu0 %v2199_v35 }
 0x25e   : >> { %v431_v36 = vpop.xlane.xlu0 %430 }
 0x25f   : >> { %2200 = vrcp.f32 %v431_v36 }
 0x26c   : >> { %v2201_v38 = vpop.eup %2200 }
 0x26d   : >> { %v433_v40 = vmul.f32 %v2201_v38, %v2199_v35 }
 0x26f   : >> { %v2619_v41 = vsub.f32 %v433_v40, %v2616_v39 }
 0x271   : >> { %435 = vxpose.xlu1.b32.start.end [1/1] (short) %v2619_v41, 128 }
 0x2ed   : >> { %v451_v42 = vpop.trf.xlu1 }
 0x2ee   : >> { %1937 = vmatprep.mubr.msk.f32.mxu1 %vm467_vm3, %v451_v42 }
 0x2f1   : >> { %v452_v43 = vpop.trf.xlu1 }
 0x2f2   : >> { %1938 = vmatmul.mubr.msk.f32.vlgmr.msra.gmra.mxu1 %vm467_vm3, %v452_v43 }
 0x2f5   : >> { %v453_v44 = vpop.trf.xlu1 }
 0x2f6   : >> { %1940 = vmatprep.mubr.msk.f32.mxu1 %vm467_vm3, %v453_v44 }
 0x2f9   : >> { %v454_v45 = vpop.trf.xlu1 }
 0x2fa   : >> { %1941 = vmatmul.mubr.msk.f32.gmra.mxu1 %vm467_vm3, %v454_v45 }
 0x2fd   : >> { %v455_v46 = vpop.trf.xlu1 }
 0x2fe   : >> { %1943 = vmatprep.mubr.msk.f32.mxu1 %vm467_vm3, %v455_v46 }
 0x301   : >> { %v456_v47 = vpop.trf.xlu1 }
 0x302   : >> { %1944 = vmatmul.mubr.msk.f32.gmra.mxu1 %vm467_vm3, %v456_v47 }
 0x305   : >> { %v457_v48 = vpop.trf.xlu1 }
 0x306   : >> { %1946 = vmatprep.mubr.msk.f32.mxu1 %vm467_vm3, %v457_v48 }
 0x309   : >> { %v458_v49 = vpop.trf.xlu1 }
 0x30a   : >> { %1947 = vmatmul.mubr.msk.f32.gmra.mxu1 %vm467_vm3, %v458_v49 }
 0x30d   : >> { %v459_v50 = vpop.trf.xlu1 }
 0x30e   : >> { %1949 = vmatprep.mubr.msk.f32.mxu1 %vm467_vm3, %v459_v50 }
 0x311   : >> { %v460_v51 = vpop.trf.xlu1 }
 0x312   : >> { %1950 = vmatmul.mubr.msk.f32.gmra.mxu1 %vm467_vm3, %v460_v51 }
 0x315   : >> { %v461_v52 = vpop.trf.xlu1 }
 0x316   : >> { %1952 = vmatprep.mubr.msk.f32.mxu1 %vm467_vm3, %v461_v52 }
 0x319   : >> { %v462_v53 = vpop.trf.xlu1 }
 0x31a   : >> { %1953 = vmatmul.mubr.msk.f32.gmra.mxu1 %vm467_vm3, %v462_v53 }
 0x31d   : >> { %v463_v54 = vpop.trf.xlu1 }
 0x31e   : >> { %1955 = vmatprep.mubr.msk.f32.mxu1 %vm467_vm3, %v463_v54 }
 0x321   : >> { %v464_v55 = vpop.trf.xlu1 }
 0x322   : >> { %1956 = vmatmul.mubr.msk.f32.gmra.mxu1 %vm467_vm3, %v464_v55 }
 0x325   : >> { %v465_v56 = vpop.trf.xlu1 }
 0x326   : >> { %1958 = vmatprep.mubr.msk.f32.mxu1 %vm467_vm3, %v465_v56 }
 0x329   : >> { %v466_v57 = vpop.trf.xlu1 }
 0x32a   : >> { %1959 = vmatmul.mubr.msk.f32.gmra.mxu1 %vm467_vm3, %v466_v57 }
 0x32b   : >> { %1993 = vmatprep.mubr.msk.f32.mxu1 %vm2371_vm1, %v2370_v21 }
 0x3b2   : >> { %v2640_v58 = vpop.f32.mrf.mxu1 }
 0x3b4   : >> { %v2642_v59 = vpop.f32.mrf.mxu1 }
 0x3ba   : >> { %v1942_v60 = vpop.f32.mrf.mxu1 }
 0x3bc   : >> { %v2644_v61 = vpop.f32.mrf.mxu1 }
 0x3c2   : >> { %v1945_v62 = vpop.f32.mrf.mxu1 }
 0x3c3   : >> { %v672_v55 = vmul.f32 0.0125, %v1945_v62 }
 0x3c4   : >> { %v602_v63 = vpop.f32.mrf.mxu1 }
 0x3c5   : >> { %v2697_v57 = vsub.f32 %v2505_v9, %v672_v55 }
 0x3ca   : >> { %v1948_v2 = vpop.f32.mrf.mxu1 }
 0x3cb   : >> { %v674_v51 = vmul.f32 0.0125, %v1948_v2  ;;  %v671_v2 = vmul.f32 0.0125, %v602_v63  ;;  %v668_v63 = vmul.f32 0.0125, %v2640_v58 }
 0x3cc   : >> { %v612_v23 = vpop.f32.mrf.mxu1  ;;  %v661_v58 = vrot.slane %v2619_v41, 4 }
 0x3cd   : >> { %v2687_v53 = vsub.f32 %v2519_v11, %v674_v51  ;;  %v673_v54 = vmul.f32 0.0125, %v612_v23  ;;  %v670_v23 = vmul.f32 0.0125, %v1942_v60 }
 0x3cf   : >> { %v2692_v56 = vsub.f32 %v2517_v10, %v673_v54  ;;  %v2707_v62 = vsub.f32 %v2501_v7, %v670_v23 }
 0x3d2   : >> { %v1951_v24 = vpop.f32.mrf.mxu1 }
 0x3d3   : >> { %v676_v47 = vmul.f32 0.0125, %v1951_v24  ;;  %v2702_v24 = vsub.f32 %v2503_v8, %v671_v2 }
 0x3d4   : >> { %v622_v26 = vpop.f32.mrf.mxu1 }
 0x3d5   : >> { %v2677_v49 = vsub.f32 %v2523_v13, %v676_v47  ;;  %v675_v50 = vmul.f32 0.0125, %v622_v26  ;;  %v669_v26 = vmul.f32 0.0125, %v2644_v61 }
 0x3d7   : >> { %v2682_v52 = vsub.f32 %v2521_v12, %v675_v50  ;;  %v2714_v60 = vsub.f32 %v2499_v6, %v669_v26 }
 0x3da   : >> { %v1954_v27 = vpop.f32.mrf.mxu1 }
 0x3db   : >> { %v678_v43 = vmul.f32 0.0125, %v1954_v27  ;;  %v2719_v27 = vsub.f32 %v2497_v5, %v668_v63 }
 0x3dc   : >> { %v632_v28 = vpop.f32.mrf.mxu1 }
 0x3dd   : >> { %v2667_v45 = vsub.f32 %v2527_v15, %v678_v43  ;;  %v677_v46 = vmul.f32 0.0125, %v632_v28  ;;  %v667_v28 = vmul.f32 0.0125, %v2642_v59  ;;  %v662_v59 = vadd.f32 %v661_v58, %v2619_v41 }
 0x3df   : >> { %v2672_v48 = vsub.f32 %v2525_v14, %v677_v46  ;;  %v2725_v61 = vsub.f32 %v2495_v4, %v667_v28 }
 0x3e2   : >> { %v1957_v29 = vpop.f32.mrf.mxu1 }
 0x3e3   : >> { %v680_v37 = vmul.f32 0.0125, %v1957_v29  ;;  %v663_v29 = vrot.slane %v662_v59, 2 }
 0x3e4   : >> { %v642_v31 = vpop.f32.mrf.mxu1 }
 0x3e5   : >> { %v2657_v40 = vsub.f32 %v2531_v17, %v680_v37  ;;  %v679_v42 = vmul.f32 0.0125, %v642_v31  ;;  %v664_v31 = vadd.f32 %v663_v29, %v662_v59 }
 0x3e7   : >> { %v2662_v44 = vsub.f32 %v2529_v16, %v679_v42 }
 0x3ea   : >> { %v1960_v32 = vpop.f32.mrf.mxu1 }
 0x3eb   : >> { %v682_v33 = vmul.f32 0.0125, %v1960_v32  ;;  %v665_v32 = vrot.slane %v664_v31, 1 }
 0x3ec   : >> { %v652_v34 = vpop.f32.mrf.mxu1 }
 0x3ed   : >> { %v2647_v35 = vsub.f32 %v2535_v19, %v682_v33  ;;  %v681_v36 = vmul.f32 0.0125, %v652_v34  ;;  %v666_v33 = vadd.f32 %v665_v32, %v664_v31 }
 0x3ef   : >> { %1962 = vmatpush3.xpose.msra.mxu1 %v2647_v35  ;;  %v2652_v38 = vsub.f32 %v2533_v18, %v681_v36  ;;  %v699_v34 = vmul.f32 0.0125, %v666_v33 }
 0x3f0   : >> { %1963 = vmatprep.subr.mxu1 %v2370_v21 }
 0x3f1   : >> { %v2735_v36 = vsub.f32 %v2540_v20, %v699_v34 }
 0x3f3   : >> { %1964 = vmatpush3.xpose.msra.mxu1 %v2652_v38  ;;  %v701_v37 = vadd.f32 %v2735_v36, %v2493_v3 }
 0x3f4   : >> { %1965 = vmatprep.subr.mxu1 %v2370_v21 }
 0x3f5   : >> { %v706_v42 = vrot.slane %v701_v37, %v2608_v25 }
 0x3f7   : >> { %1966 = vmatpush3.xpose.msra.mxu1 %v2657_v40 }
 0x3f8   : >> { %1967 = vmatprep.subr.mxu1 %v2370_v21 }
 0x3fb   : >> { %1968 = vmatpush3.xpose.msra.mxu1 %v2662_v44 }
 0x3fc   : >> { %1969 = vmatprep.subr.mxu1 %v2370_v21 }
 0x3ff   : >> { %1970 = vmatpush3.xpose.msra.mxu1 %v2667_v45 }
 0x400   : >> { %1971 = vmatprep.subr.mxu1 %v2370_v21 }
 0x403   : >> { %1972 = vmatpush3.xpose.msra.mxu1 %v2672_v48 }
 0x404   : >> { %1973 = vmatprep.subr.mxu1 %v2370_v21 }
 0x407   : >> { %1974 = vmatpush3.xpose.msra.mxu1 %v2677_v49 }
 0x408   : >> { %1975 = vmatprep.subr.mxu1 %v2370_v21 }
 0x40b   : >> { %1976 = vmatpush3.xpose.msra.mxu1 %v2682_v52 }
 0x40c   : >> { %1977 = vmatprep.subr.mxu1 %v2370_v21 }
 0x40f   : >> { %1978 = vmatpush3.xpose.msra.mxu1 %v2687_v53 }
 0x410   : >> { %1979 = vmatprep.subr.mxu1 %v2370_v21 }
 0x413   : >> { %1980 = vmatpush3.xpose.msra.mxu1 %v2692_v56 }
 0x414   : >> { %1981 = vmatprep.subr.mxu1 %v2370_v21 }
 0x417   : >> { %1982 = vmatpush3.xpose.msra.mxu1 %v2697_v57 }
 0x418   : >> { %1983 = vmatprep.subr.mxu1 %v2370_v21 }
 0x41b   : >> { %1984 = vmatpush3.xpose.msra.mxu1 %v2702_v24 }
 0x41c   : >> { %1985 = vmatprep.subr.mxu1 %v2370_v21 }
 0x41f   : >> { %1986 = vmatpush3.xpose.msra.mxu1 %v2707_v62 }
 0x420   : >> { %1987 = vmatprep.subr.mxu1 %v2370_v21 }
 0x423   : >> { %1988 = vmatpush3.xpose.msra.mxu1 %v2714_v60 }
 0x424   : >> { %1989 = vmatprep.subr.mxu1 %v2370_v21 }
 0x427   : >> { %1990 = vmatpush3.xpose.msra.mxu1 %v2719_v27 }
 0x428   : >> { %1991 = vmatprep.subr.mxu1 %v2370_v21 }
 0x42b   : >> { %1992 = vmatpush3.xpose.msra.mxu1 %v2725_v61 }
 0x42c   : >> { %1996 = vmatprep.subr.mxu1 %v2567_v22 }
 0x42e   : >> { %1994 = vmatmul.mubr.f32.vlgmr.msra.gmra.mxu1 %v2567_v22 }
 0x42f   : >> { %1997 = vmatpush3.msra.mxu1 %v2567_v22 }
 0x430   : >> { %2022 = vmatprep.subr.mxu1 %v2370_v21 }
 0x4ee   : >> { %v774_v43 = vpop.f32.mrf.mxu1 }
 0x4ef   : >> { %v775_v46 = vadd.f32 %v774_v43, %v706_v42 }
 0x4f0   : >> { %v1995_v47 = vpop.f32.mrf.mxu1 }
 0x4f1   : >> { %778 = vmax.xlane.f32.xlu0 %v775_v46 }
 0x57a   : >> { %v779_v50 = vpop.xlane.xlu0 %778 }
 0x57b   : >> { %v780_v51 = vsub.f32 %v775_v46, %v779_v50 }
 0x57d   : >> { %v781_v41 = vmul.f32 1.442695, %v780_v51 }
 0x57f   : >> { %2202 = vpow2.f32 %v781_v41 }
 0x58c   : >> { %v2203_v54 = vpop.eup %2202 }
 0x58d   : >> { %783 = vadd.xlane.f32.xlu0 %v2203_v54 }
 0x616   : >> { %v784_v55 = vpop.xlane.xlu0 %783 }
 0x617   : >> { %2204 = vrcp.f32 %v784_v55 }
 0x624   : >> { %v2205_v2 = vpop.eup %2204 }
 0x625   : >> { %v786_v23 = vmul.f32 %v2205_v2, %v2203_v54 }
 0x627   : >> { %v2741_v26 = vsub.f32 %v786_v23, %v2616_v39 }
 0x629   : >> { %788 = vxpose.xlu0.b32.start.end [1/1] (short) %v2741_v26, 128 }
 0x652   : >> { %2197 = vset.pattern.permute.xlu0 %v2372_v30 }
 0x6a5   : >> { %v804_v63 = vpop.trf.xlu0 }
 0x6a6   : >> { %1998 = vmatprep.mubr.msk.f32.mxu1 %vm467_vm3, %v804_v63 }
 0x6a9   : >> { %v805_v28 = vpop.trf.xlu0 }
 0x6aa   : >> { %1999 = vmatmul.mubr.msk.f32.vlgmr.msra.gmra.mxu1 %vm467_vm3, %v805_v28 }
 0x6ad   : >> { %v806_v58 = vpop.trf.xlu0 }
 0x6ae   : >> { %2001 = vmatprep.mubr.msk.f32.mxu1 %vm467_vm3, %v806_v58 }
 0x6b1   : >> { %v807_v59 = vpop.trf.xlu0 }
 0x6b2   : >> { %2002 = vmatmul.mubr.msk.f32.gmra.mxu1 %vm467_vm3, %v807_v59 }
 0x6b5   : >> { %v808_v29 = vpop.trf.xlu0 }
 0x6b6   : >> { %2004 = vmatprep.mubr.msk.f32.mxu1 %vm467_vm3, %v808_v29 }
 0x6b9   : >> { %v809_v31 = vpop.trf.xlu0 }
 0x6ba   : >> { %2005 = vmatmul.mubr.msk.f32.gmra.mxu1 %vm467_vm3, %v809_v31 }
 0x6bd   : >> { %v810_v32 = vpop.trf.xlu0 }
 0x6be   : >> { %2007 = vmatprep.mubr.msk.f32.mxu1 %vm467_vm3, %v810_v32 }
 0x6c1   : >> { %v811_v30 = vpop.trf.xlu0 }
 0x6c2   : >> { %2008 = vmatmul.mubr.msk.f32.gmra.mxu1 %vm467_vm3, %v811_v30 }
 0x6c5   : >> { %v812_v33 = vpop.trf.xlu0 }
 0x6c6   : >> { %2010 = vmatprep.mubr.msk.f32.mxu1 %vm467_vm3, %v812_v33 }
 0x6c9   : >> { %v813_v34 = vpop.trf.xlu0 }
 0x6ca   : >> { %2011 = vmatmul.mubr.msk.f32.gmra.mxu1 %vm467_vm3, %v813_v34 }
 0x6cd   : >> { %v814_v37 = vpop.trf.xlu0 }
 0x6ce   : >> { %2013 = vmatprep.mubr.msk.f32.mxu1 %vm467_vm3, %v814_v37 }
 0x6d1   : >> { %v815_v42 = vpop.trf.xlu0 }
 0x6d2   : >> { %2014 = vmatmul.mubr.msk.f32.gmra.mxu1 %vm467_vm3, %v815_v42 }
 0x6d5   : >> { %v816_v43 = vpop.trf.xlu0 }
 0x6d6   : >> { %2016 = vmatprep.mubr.msk.f32.mxu1 %vm467_vm3, %v816_v43 }
 0x6d9   : >> { %v817_v46 = vpop.trf.xlu0 }
 0x6da   : >> { %2017 = vmatmul.mubr.msk.f32.gmra.mxu1 %vm467_vm3, %v817_v46 }
 0x6dd   : >> { %v818_v47 = vpop.trf.xlu0 }
 0x6de   : >> { %2019 = vmatprep.mubr.msk.f32.mxu1 %vm467_vm3, %v818_v47 }
 0x6e1   : >> { %v819_v50 = vpop.trf.xlu0 }
 0x6e2   : >> { %2020 = vmatmul.mubr.msk.f32.gmra.mxu1 %vm467_vm3, %v819_v50 }
 0x6e3   : >> { %2054 = vmatprep.mubr.msk.f32.mxu1 %vm2371_vm1, %v2370_v21 }
 0x76a   : >> { %v2763_v51 = vpop.f32.mrf.mxu1 }
 0x76c   : >> { %v2765_v41 = vpop.f32.mrf.mxu1 }
 0x772   : >> { %v2003_v54 = vpop.f32.mrf.mxu1 }
 0x774   : >> { %v2767_v55 = vpop.f32.mrf.mxu1 }
 0x77a   : >> { %v2006_v2 = vpop.f32.mrf.mxu1 }
 0x77c   : >> { %v954_v23 = vpop.f32.mrf.mxu1 }
 0x782   : >> { %v2009_v63 = vpop.f32.mrf.mxu1 }
 0x784   : >> { %v964_v28 = vpop.f32.mrf.mxu1 }
 0x78a   : >> { %v2012_v58 = vpop.f32.mrf.mxu1 }
 0x78c   : >> { %v974_v59 = vpop.f32.mrf.mxu1 }
 0x792   : >> { %v2015_v29 = vpop.f32.mrf.mxu1 }
 0x794   : >> { %v984_v31 = vpop.f32.mrf.mxu1 }
 0x79a   : >> { %v2018_v32 = vpop.f32.mrf.mxu1 }
 0x79b   : >> { %v1032_v46 = vmul.f32 0.0125, %v2018_v32  ;;  %v1029_v32 = vmul.f32 0.0125, %v984_v31 }
 0x79c   : >> { %v994_v30 = vpop.f32.mrf.mxu1 }
 0x79d   : >> { %v2780_v50 = vsub.f32 %v2657_v40, %v1032_v46  ;;  %v1028_v40 = vmul.f32 0.0125, %v2012_v58  ;;  %v1025_v58 = vmul.f32 0.0125, %v964_v28 }
 0x7a2   : >> { %v2021_v33 = vpop.f32.mrf.mxu1 }
 0x7a3   : >> { %v1034_v34 = vmul.f32 0.0125, %v2021_v33  ;;  %v1031_v33 = vmul.f32 0.0125, %v994_v30  ;;  %v2795_v30 = vsub.f32 %v2672_v48, %v1029_v32 }
 0x7a4   : >> { %v1004_v37 = vpop.f32.mrf.mxu1 }
 0x7a5   : >> { %v2770_v42 = vsub.f32 %v2647_v35, %v1034_v34  ;;  %v1033_v43 = vmul.f32 0.0125, %v1004_v37  ;;  %v1030_v35 = vmul.f32 0.0125, %v2015_v29  ;;  %v2785_v34 = vsub.f32 %v2662_v44, %v1031_v33 }
 0x7a6   : >> { %v2800_v44 = vsub.f32 %v2677_v49, %v1028_v40  ;;  %v1027_v29 = vmul.f32 0.0125, %v974_v59  ;;  %v1024_v49 = vmul.f32 0.0125, %v2006_v2  ;;  %v2815_v59 = vsub.f32 %v2692_v56, %v1025_v58 }
 0x7a7   : >> { %2023 = vmatpush3.xpose.msra.mxu1 %v2770_v42  ;;  %v2775_v47 = vsub.f32 %v2652_v38, %v1033_v43  ;;  %v2790_v38 = vsub.f32 %v2667_v45, %v1030_v35  ;;  %v1026_v45 = vmul.f32 0.0125, %v2009_v63  ;;  %v1023_v63 = vmul.f32 0.0125, %v954_v23 }
 0x7a8   : >> { %2024 = vmatprep.subr.mxu1 %v2370_v21  ;;  %v2805_v31 = vsub.f32 %v2682_v52, %v1027_v29  ;;  %v2820_v52 = vsub.f32 %v2697_v57, %v1024_v49  ;;  %v1021_v2 = vmul.f32 0.0125, %v2767_v55  ;;  %v1020_v57 = vmul.f32 0.0125, %v2763_v51 }
 0x7a9   : >> { %v2810_v48 = vsub.f32 %v2687_v53, %v1026_v45  ;;  %v1022_v53 = vmul.f32 0.0125, %v2003_v54  ;;  %v2825_v28 = vsub.f32 %v2702_v24, %v1023_v63 }
 0x7aa   : >> { %v2837_v54 = vsub.f32 %v2714_v60, %v1021_v2  ;;  %v2842_v24 = vsub.f32 %v2719_v27, %v1020_v57  ;;  %v1013_v60 = vrot.slane %v2741_v26, 4 }
 0x7ab   : >> { %2025 = vmatpush3.xpose.msra.mxu1 %v2775_v47  ;;  %v2830_v56 = vsub.f32 %v2707_v62, %v1022_v53  ;;  %v1019_v62 = vmul.f32 0.0125, %v2765_v41 }
 0x7ac   : >> { %2026 = vmatprep.subr.mxu1 %v2370_v21  ;;  %v1014_v51 = vadd.f32 %v1013_v60, %v2741_v26 }
 0x7ad   : >> { %v2848_v55 = vsub.f32 %v2725_v61, %v1019_v62 }
 0x7ae   : >> { %v1015_v23 = vrot.slane %v1014_v51, 2 }
 0x7af   : >> { %2027 = vmatpush3.xpose.msra.mxu1 %v2780_v50 }
 0x7b0   : >> { %2028 = vmatprep.subr.mxu1 %v2370_v21  ;;  %v1016_v27 = vadd.f32 %v1015_v23, %v1014_v51 }
 0x7b2   : >> { %v1017_v37 = vrot.slane %v1016_v27, 1 }
 0x7b3   : >> { %2029 = vmatpush3.xpose.msra.mxu1 %v2785_v34 }
 0x7b4   : >> { %2030 = vmatprep.subr.mxu1 %v2370_v21  ;;  %v1018_v43 = vadd.f32 %v1017_v37, %v1016_v27 }
 0x7b6   : >> { %v1051_v41 = vmul.f32 0.0125, %v1018_v43 }
 0x7b7   : >> { %2031 = vmatpush3.xpose.msra.mxu1 %v2790_v38 }
 0x7b8   : >> { %2032 = vmatprep.subr.mxu1 %v2370_v21  ;;  %v1052_v46 = vsub.f32 %v2735_v36, %v1051_v41 }
 0x7ba   : >> { %v1053_v33 = vadd.f32 %v1052_v46, %v2493_v3 }
 0x7bb   : >> { %2033 = vmatpush3.xpose.msra.mxu1 %v2795_v30 }
 0x7bc   : >> { %2034 = vmatprep.subr.mxu1 %v2370_v21  ;;  %v1058_v61 = vrot.slane %v1053_v33, %v2608_v25 }
 0x7bf   : >> { %2035 = vmatpush3.xpose.msra.mxu1 %v2800_v44 }
 0x7c0   : >> { %2036 = vmatprep.subr.mxu1 %v2370_v21 }
 0x7c3   : >> { %2037 = vmatpush3.xpose.msra.mxu1 %v2805_v31 }
 0x7c4   : >> { %2038 = vmatprep.subr.mxu1 %v2370_v21 }
 0x7c7   : >> { %2039 = vmatpush3.xpose.msra.mxu1 %v2810_v48 }
 0x7c8   : >> { %2040 = vmatprep.subr.mxu1 %v2370_v21 }
 0x7cb   : >> { %2041 = vmatpush3.xpose.msra.mxu1 %v2815_v59 }
 0x7cc   : >> { %2042 = vmatprep.subr.mxu1 %v2370_v21 }
 0x7cf   : >> { %2043 = vmatpush3.xpose.msra.mxu1 %v2820_v52 }
 0x7d0   : >> { %2044 = vmatprep.subr.mxu1 %v2370_v21 }
 0x7d3   : >> { %2045 = vmatpush3.xpose.msra.mxu1 %v2825_v28 }
 0x7d4   : >> { %2046 = vmatprep.subr.mxu1 %v2370_v21 }
 0x7d7   : >> { %2047 = vmatpush3.xpose.msra.mxu1 %v2830_v56 }
 0x7d8   : >> { %2048 = vmatprep.subr.mxu1 %v2370_v21 }
 0x7db   : >> { %2049 = vmatpush3.xpose.msra.mxu1 %v2837_v54 }
 0x7dc   : >> { %2050 = vmatprep.subr.mxu1 %v2370_v21 }
 0x7df   : >> { %2051 = vmatpush3.xpose.msra.mxu1 %v2842_v24 }
 0x7e0   : >> { %2052 = vmatprep.subr.mxu1 %v2370_v21 }
 0x7e3   : >> { %2053 = vmatpush3.xpose.msra.mxu1 %v2848_v55 }
 0x7e6   : >> { %2055 = vmatmul.mubr.f32.vlgmr.msra.gmra.mxu1 %v2567_v22 }
 0x8a6   : >> { %v1126_v35 = vpop.f32.mrf.mxu1 }
 0x8a7   : >> { %v1127_v32 = vadd.f32 %v1126_v35, %v1058_v61 }
 0x8a8   : >> { %v2056_v40 = vpop.f32.mrf.mxu1 }
 0x8a9   : >> { %1130 = vmax.xlane.f32.xlu1 %v1127_v32 }
 0x932   : >> { %v1131_v29 = vpop.xlane.xlu1 %1130 }
 0x933   : >> { %v1132_v45 = vsub.f32 %v1127_v32, %v1131_v29 }
 0x935   : >> { %v1133_v58 = vmul.f32 1.442695, %v1132_v45 }
 0x937   : >> { %2206 = vpow2.f32 %v1133_v58 }
 0x944   : >> { %v2207_v26 = vpop.eup %2206 }
 0x945   : >> { %1135 = vadd.xlane.f32.xlu0 %v2207_v26 }
 0x9ce   : >> { %v1136_v49 = vpop.xlane.xlu0 %1135 }
 0x9cf   : >> { %2208 = vrcp.f32 %v1136_v49 }
 0x9dc   : >> { %v2209_v63 = vpop.eup %2208 }
 0x9dd   : >> { %v1138_v36 = vmul.f32 %v2209_v63, %v2207_v26 }
 0x9df   : >> { %v1139_v53 = vsub.f32 %v1138_v36, %v2616_v39 }
 0x9e1   : >> { %1140 = vxpose.xlu1.b32.start.end [1/1] (short) %v1139_v53, 128  ;;  %v1365_v2 = vrot.slane %v1139_v53, 4 }
 0x9e3   : >> { %v1366_v57 = vadd.f32 %v1365_v2, %v1139_v53 }
 0x9e5   : >> { %v1367_v62 = vrot.slane %v1366_v57, 2 }
 0x9e7   : >> { %v1368_v60 = vadd.f32 %v1367_v62, %v1366_v57 }
 0x9e9   : >> { %v1369_v51 = vrot.slane %v1368_v60, 1 }
 0x9eb   : >> { %v1370_v23 = vadd.f32 %v1369_v51, %v1368_v60 }
 0x9ed   : >> { %v1403_v27 = vmul.f32 0.0125, %v1370_v23 }
 0x9ef   : >> { %v2860_v37 = vsub.f32 %v1052_v46, %v1403_v27 }
 0x9f1   : >> { %1408 = vst [vmem:[%s1407_s11] sm:$0x1] %v2860_v37 }
 0xa5d   : >> { %v1156_v43 = vpop.trf.xlu1 }
 0xa5e   : >> { %2059 = vmatprep.mubr.msk.f32.mxu0 %vm467_vm3, %v1156_v43 }
 0xa61   : >> { %v1157_v41 = vpop.trf.xlu1 }
 0xa62   : >> { %2060 = vmatmul.mubr.msk.f32.vlgmr.msra.gmra.mxu0 %vm467_vm3, %v1157_v41 }
 0xa65   : >> { %v1158_v39 = vpop.trf.xlu1 }
 0xa66   : >> { %2062 = vmatprep.mubr.msk.f32.mxu0 %vm467_vm3, %v1158_v39 }
 0xa69   : >> { %v1159_v33 = vpop.trf.xlu1 }
 0xa6a   : >> { %2063 = vmatmul.mubr.msk.f32.gmra.mxu0 %vm467_vm3, %v1159_v33 }
 0xa6d   : >> { %v1160_v61 = vpop.trf.xlu1 }
 0xa6e   : >> { %2065 = vmatprep.mubr.msk.f32.mxu0 %vm467_vm3, %v1160_v61 }
 0xa71   : >> { %v1161_v35 = vpop.trf.xlu1 }
 0xa72   : >> { %2066 = vmatmul.mubr.msk.f32.gmra.mxu0 %vm467_vm3, %v1161_v35 }
 0xa75   : >> { %v1162_v46 = vpop.trf.xlu1 }
 0xa76   : >> { %2068 = vmatprep.mubr.msk.f32.mxu0 %vm467_vm3, %v1162_v46 }
 0xa79   : >> { %v1163_v32 = vpop.trf.xlu1 }
 0xa7a   : >> { %2069 = vmatmul.mubr.msk.f32.gmra.mxu0 %vm467_vm3, %v1163_v32 }
 0xa7d   : >> { %v1164_v40 = vpop.trf.xlu1 }
 0xa7e   : >> { %2071 = vmatprep.mubr.msk.f32.mxu0 %vm467_vm3, %v1164_v40 }
 0xa81   : >> { %v1165_v29 = vpop.trf.xlu1 }
 0xa82   : >> { %2072 = vmatmul.mubr.msk.f32.gmra.mxu0 %vm467_vm3, %v1165_v29 }
 0xa85   : >> { %v1166_v45 = vpop.trf.xlu1 }
 0xa86   : >> { %2074 = vmatprep.mubr.msk.f32.mxu0 %vm467_vm3, %v1166_v45 }
 0xa89   : >> { %v1167_v58 = vpop.trf.xlu1 }
 0xa8a   : >> { %2075 = vmatmul.mubr.msk.f32.gmra.mxu0 %vm467_vm3, %v1167_v58 }
 0xa8d   : >> { %v1168_v26 = vpop.trf.xlu1 }
 0xa8e   : >> { %2077 = vmatprep.mubr.msk.f32.mxu0 %vm467_vm3, %v1168_v26 }
 0xa91   : >> { %v1169_v49 = vpop.trf.xlu1 }
 0xa92   : >> { %2078 = vmatmul.mubr.msk.f32.gmra.mxu0 %vm467_vm3, %v1169_v49 }
 0xa95   : >> { %v1170_v63 = vpop.trf.xlu1 }
 0xa96   : >> { %2080 = vmatprep.mubr.msk.f32.mxu0 %vm467_vm3, %v1170_v63 }
 0xa99   : >> { %v1171_v36 = vpop.trf.xlu1 }
 0xa9a   : >> { %2081 = vmatmul.mubr.msk.f32.gmra.mxu0 %vm467_vm3, %v1171_v36 }
 0xa9b   : >> { %2115 = vmatprep.mubr.msk.f32.mxu0 %vm2371_vm1, %v2370_v21 }
 0xb22   : >> { %v2881_v53 = vpop.f32.mrf.mxu0 }
 0xb24   : >> { %v1286_v2 = vpop.f32.mrf.mxu0 }
 0xb25   : >> { %v1371_v57 = vmul.f32 0.0125, %v1286_v2 }
 0xb27   : >> { %v2886_v62 = vsub.f32 %v2848_v55, %v1371_v57 }
 0xb29   : >> { %1406 = vst [vmem:[%s1405_s12] sm:$0xff] %v2886_v62  ;;  %s2937_s12 = scalar_lea.hbm (%p333_p8), %s3050_s5, %s1779_s20 }
 0xb2a   : >> { %v2064_v60 = vpop.f32.mrf.mxu0 }
 0xb2c   : >> { %v2889_v51 = vpop.f32.mrf.mxu0 }
 0xb32   : >> { %v2067_v23 = vpop.f32.mrf.mxu0 }
 0xb34   : >> { %v1306_v27 = vpop.f32.mrf.mxu0 }
 0xb3a   : >> { %v2070_v43 = vpop.f32.mrf.mxu0 }
 0xb3c   : >> { %v1316_v41 = vpop.f32.mrf.mxu0 }
 0xb42   : >> { %v2073_v39 = vpop.f32.mrf.mxu0 }
 0xb44   : >> { %v1326_v33 = vpop.f32.mrf.mxu0 }
 0xb4a   : >> { %v2076_v61 = vpop.f32.mrf.mxu0 }
 0xb4b   : >> { %v1382_v2 = vmul.f32 0.0125, %v2076_v61  ;;  %v1379_v61 = vmul.f32 0.0125, %v1326_v33 }
 0xb4c   : >> { %v1336_v35 = vpop.f32.mrf.mxu0 }
 0xb52   : >> { %v2079_v46 = vpop.f32.mrf.mxu0 }
 0xb53   : >> { %v1384_v26 = vmul.f32 0.0125, %v2079_v46  ;;  %v1381_v46 = vmul.f32 0.0125, %v1336_v35 }
 0xb54   : >> { %v1346_v32 = vpop.f32.mrf.mxu0 }
 0xb55   : >> { %v1400_v63 = vsub.f32 %v2780_v50, %v1384_v26  ;;  %v1383_v36 = vmul.f32 0.0125, %v1346_v32  ;;  %v1395_v32 = vsub.f32 %v2805_v31, %v1379_v61  ;;  %v1374_v31 = vmul.f32 0.0125, %v2064_v60 }
 0xb57   : >> { %v1399_v57 = vsub.f32 %v2785_v34, %v1383_v36  ;;  %v1378_v34 = vmul.f32 0.0125, %v2070_v43  ;;  %v1375_v43 = vmul.f32 0.0125, %v1306_v27 }
 0xb59   : >> { %v1391_v33 = vsub.f32 %v2825_v28, %v1375_v43 }
 0xb5a   : >> { %v2082_v40 = vpop.f32.mrf.mxu0 }
 0xb5b   : >> { %v1386_v29 = vmul.f32 0.0125, %v2082_v40  ;;  %v1397_v40 = vsub.f32 %v2795_v30, %v1381_v46  ;;  %v1376_v30 = vmul.f32 0.0125, %v2067_v23 }
 0xb5c   : >> { %v1356_v45 = vpop.f32.mrf.mxu0 }
 0xb5d   : >> { %v1402_v55 = vsub.f32 %v2770_v42, %v1386_v29  ;;  %v1385_v58 = vmul.f32 0.0125, %v1356_v45  ;;  %v1398_v42 = vsub.f32 %v2790_v38, %v1382_v2  ;;  %v1394_v38 = vsub.f32 %v2810_v48, %v1378_v34 }
 0xb5e   : >> { %v1390_v48 = vsub.f32 %v2830_v56, %v1374_v31  ;;  %v1413_v56 = vrot.slane %v2860_v37, %v2608_v25 }
 0xb5f   : >> { %2084 = vmatpush3.xpose.msra.mxu0 %v1402_v55  ;;  %v1401_v49 = vsub.f32 %v2775_v47, %v1385_v58  ;;  %v1380_v47 = vmul.f32 0.0125, %v2073_v39  ;;  %v1377_v39 = vmul.f32 0.0125, %v1316_v41 }
 0xb60   : >> { %2085 = vmatprep.subr.mxu0 %v2370_v21 }
 0xb61   : >> { %v1396_v50 = vsub.f32 %v2800_v44, %v1380_v47  ;;  %v1393_v35 = vsub.f32 %v2815_v59, %v1377_v39  ;;  %v1392_v44 = vsub.f32 %v2820_v52, %v1376_v30  ;;  %v1373_v59 = vmul.f32 0.0125, %v2889_v51 }
 0xb62   : >> { %v1372_v52 = vmul.f32 0.0125, %v2881_v53 }
 0xb63   : >> { %2086 = vmatpush3.xpose.msra.mxu0 %v1401_v49  ;;  %v1389_v23 = vsub.f32 %v2837_v54, %v1373_v59 }
 0xb64   : >> { %2087 = vmatprep.subr.mxu0 %v2370_v21  ;;  %v1388_v28 = vsub.f32 %v2842_v24, %v1372_v52 }
 0xb67   : >> { %2088 = vmatpush3.xpose.msra.mxu0 %v1400_v63 }
 0xb68   : >> { %2089 = vmatprep.subr.mxu0 %v2370_v21 }
 0xb6b   : >> { %2090 = vmatpush3.xpose.msra.mxu0 %v1399_v57 }
 0xb6c   : >> { %2091 = vmatprep.subr.mxu0 %v2370_v21 }
 0xb6f   : >> { %2092 = vmatpush3.xpose.msra.mxu0 %v1398_v42 }
 0xb70   : >> { %2093 = vmatprep.subr.mxu0 %v2370_v21 }
 0xb73   : >> { %2094 = vmatpush3.xpose.msra.mxu0 %v1397_v40 }
 0xb74   : >> { %2095 = vmatprep.subr.mxu0 %v2370_v21 }
 0xb77   : >> { %2096 = vmatpush3.xpose.msra.mxu0 %v1396_v50 }
 0xb78   : >> { %2097 = vmatprep.subr.mxu0 %v2370_v21 }
 0xb7b   : >> { %2098 = vmatpush3.xpose.msra.mxu0 %v1395_v32 }
 0xb7c   : >> { %2099 = vmatprep.subr.mxu0 %v2370_v21 }
 0xb7f   : >> { %2100 = vmatpush3.xpose.msra.mxu0 %v1394_v38 }
 0xb80   : >> { %2101 = vmatprep.subr.mxu0 %v2370_v21 }
 0xb83   : >> { %2102 = vmatpush3.xpose.msra.mxu0 %v1393_v35 }
 0xb84   : >> { %2103 = vmatprep.subr.mxu0 %v2370_v21 }
 0xb87   : >> { %2104 = vmatpush3.xpose.msra.mxu0 %v1392_v44 }
 0xb88   : >> { %2105 = vmatprep.subr.mxu0 %v2370_v21 }
 0xb8b   : >> { %2106 = vmatpush3.xpose.msra.mxu0 %v1391_v33 }
 0xb8c   : >> { %2107 = vmatprep.subr.mxu0 %v2370_v21 }
 0xb8f   : >> { %2108 = vmatpush3.xpose.msra.mxu0 %v1390_v48 }
 0xb90   : >> { %2109 = vmatprep.subr.mxu0 %v2370_v21 }
 0xb93   : >> { %2110 = vmatpush3.xpose.msra.mxu0 %v1389_v23 }
 0xb94   : >> { %2111 = vmatprep.subr.mxu0 %v2370_v21 }
 0xb97   : >> { %2112 = vmatpush3.xpose.msra.mxu0 %v1388_v28 }
 0xb98   : >> { %2113 = vmatprep.subr.mxu0 %v2370_v21 }
 0xb9b   : >> { %2114 = vmatpush3.xpose.msra.mxu0 %v2886_v62 }
 0xb9e   : >> { %2116 = vmatmul.mubr.f32.vlgmr.msra.gmra.mxu0 %v2567_v22 }
 0xc5d   : > { %335 = sbr.rel (!%p333_p8) target bundleno = 53 (0x35), region = 123 }
 0xc5e   : >> { %v1481_v60 = vpop.f32.mrf.mxu0 }
 0xc5f   : >> { %v1482_v53 = vadd.f32 %v1481_v60, %v1413_v56 }
 0xc60   : >> { %v2117_v51 = vpop.f32.mrf.mxu0 }
 0xc61   : >> { %1486 = vst [vmem:[%s1485_s14] sm:$0xff] %v1482_v53  ;;  %s2942_s14 = scalar_lea.sflag (%p333_p8), [#allocation7], %s1492_s15 }
 0xc62   : > { %2249 = shalt.err (!%p2246_p1)
}
 0xc63   : > { %s2250_s18 = scalar_lea.hbm %s2937_s12, 32  ;;  %s2254_s9 = scalar_lea.hbm %s3050_s5, 64 }
 0xc64   : > { %p2251_p2 = scmp.ne.s32.totalorder %s2937_s12, %s2250_s18  ;;  %p2255_p7 = scmp.lt.s32.totalorder %s2937_s12, %s3050_s5 }
 0xc65   : > { %p2256_p6 = scmp.lt.s32.totalorder %s2254_s9, %s2250_s18 }
 0xc66   : > { %p2252_p3 = pnand %p2251_p2, %p2455_p5 }
 0xc67   : > { %p2257_p8 = por %p2256_p6, %p2255_p7 }
 0xc68   : > { %p2253_p4 = pneg %p2252_p3 }
 0xc6a   : > { %p2258_p9 = pnand %p2257_p8, %p2253_p4 }
 0xc6c   : > { %2261 = shalt.err (!%p2258_p9)
}
 0xc6d   : > { %s2374_s26 = smov 16   ;;  %s2375_s29 = smov 1  }
 0xc6e   : > { %2123 = dma.vmem_to_hbm [thread:$0]  (%p2455_p5), %s2940_s19, 32, %s2937_s12, %s2942_s14, %s2374_s26, %s2374_s26, %s2375_s29  }
 0xc6f   : > { %s1778_s13 = sshll.u32 %s2436_s25, 8  ;;  %s1511_s9 = sshll.u32 %s2544_s16, 4  ;;  %s2972_s9 = int_to_ptr.vmem [resolvable:$true] %s1511_s9 }
 0xc70   : > { %s2969_s18 = scalar_lea.hbm %s3049_s4, %s1778_s13  ;;  %s2977_s0 = scalar_lea.hbm %s3051_s6, %s1778_s13 }
 0xc71   : > { %s1488_s1 = scalar_lea.sflag [#allocation4], %s2484_s17  ;;  %s2262_s2 = scalar_lea.vmem %s2972_s9, 256 }
 0xc72   : > { %p2263_p10 = scmp.ne.s32.totalorder %s2972_s9, %s2262_s2  ;;  %s2376_s25 = smov [#allocation5]  }
 0xc73   : > { %s2266_s12 = sshll.u32 %s2376_s25, 4  ;;  %s2267_s12 = int_to_ptr.vmem [resolvable:$false] %s2266_s12 }
 0xc74   : > { %p2264_p11 = pnand %p2263_p10, %p2455_p5  ;;  %s2268_s16 = scalar_lea.vmem %s2267_s12, 512 }
 0xc75   : > { %p2269_p13 = scmp.lt.s32.totalorder %s2972_s9, %s2267_s12  ;;  %p2270_p0 = scmp.lt.s32.totalorder %s2268_s16, %s2262_s2 }
 0xc76   : > { %p2265_p12 = pneg %p2264_p11 }
 0xc77   : > { %p2271_p1 = por %p2270_p0, %p2269_p13 }
 0xc79   : > { %p2272_p2 = pnand %p2271_p1, %p2265_p12 }
 0xc7b   : > { %2275 = shalt.err (!%p2272_p2)
}
 0xc7c   : > { %s2276_s19 = scalar_lea.hbm %s2969_s18, 256  ;;  %s2280_s13 = scalar_lea.hbm %s3049_s4, 512 }
 0xc7d   : > { %p2277_p3 = scmp.ne.s32.totalorder %s2969_s18, %s2276_s19  ;;  %p2281_p6 = scmp.lt.s32.totalorder %s2969_s18, %s3049_s4 }
 0xc7e   : > { %p2282_p8 = scmp.lt.s32.totalorder %s2280_s13, %s2276_s19 }
 0xc7f   : > { %p2278_p4 = pnand %p2277_p3, %p2455_p5 }
 0xc80   : > { %p2283_p9 = por %p2282_p8, %p2281_p6 }
 0xc81   : > { %p2279_p7 = pneg %p2278_p4 }
 0xc83   : > { %p2284_p10 = pnand %p2283_p9, %p2279_p7 }
 0xc85   : > { %2287 = shalt.err (!%p2284_p10)
}
 0xc86   : > { %s2377_s2 = smov 128   ;;  %s2378_s11 = smov 8  }
 0xc87   : > { %2122 = dma.vmem_to_hbm [thread:$0]  (%p2455_p5), %s2972_s9, 256, %s2969_s18, %s1488_s1, %s2377_s2, %s2377_s2, %s2378_s11  }
 0xc88   : > { %s1543_s10 = sshll.u32 %s2550_s28, 4  ;;  %s2379_s12 = smov [#allocation8]   ;;  %s1544_s10 = int_to_ptr.vmem [resolvable:$true] %s1543_s10 }
 0xc89   : > { %s2288_s25 = scalar_lea.vmem %s1544_s10, 256  ;;  %s2292_s16 = sshll.u32 %s2379_s12, 4  ;;  %s2293_s16 = int_to_ptr.vmem [resolvable:$false] %s2292_s16 }
 0xc8a   : > { %p2289_p11 = scmp.ne.s32.totalorder %s1544_s10, %s2288_s25  ;;  %s2294_s19 = scalar_lea.vmem %s2293_s16, 512 }
 0xc8b   : > { %p2295_p0 = scmp.lt.s32.totalorder %s1544_s10, %s2293_s16  ;;  %p2296_p1 = scmp.lt.s32.totalorder %s2294_s19, %s2288_s25 }
 0xc8c   : > { %p2290_p12 = pnand %p2289_p11, %p2455_p5 }
 0xc8d   : > { %p2297_p2 = por %p2296_p1, %p2295_p0 }
 0xc8e   : > { %p2291_p13 = pneg %p2290_p12 }
 0xc90   : > { %p2298_p3 = pnand %p2297_p2, %p2291_p13 }
 0xc92   : > { %2301 = shalt.err (!%p2298_p3)
}
 0xc93   : > { %s2302_s1 = scalar_lea.hbm %s2977_s0, 256  ;;  %s2306_s18 = scalar_lea.hbm %s3051_s6, 512 }
 0xc94   : > { %p2303_p4 = scmp.ne.s32.totalorder %s2977_s0, %s2302_s1  ;;  %p2307_p8 = scmp.lt.s32.totalorder %s2977_s0, %s3051_s6 }
 0xc95   : > { %p2308_p9 = scmp.lt.s32.totalorder %s2306_s18, %s2302_s1 }
 0xc96   : > { %p2304_p7 = pnand %p2303_p4, %p2455_p5 }
 0xc97   : > { %p2309_p10 = por %p2308_p9, %p2307_p8 }
 0xc98   : > { %p2305_p6 = pneg %p2304_p7 }
 0xc9a   : > { %p2310_p11 = pnand %p2309_p10, %p2305_p6 }
 0xc9c   : > { %2313 = shalt.err (!%p2310_p11)
}
 0xc9d   : > { %2124 = dma.vmem_to_hbm [thread:$0]  (%p2455_p5), %s1544_s10, 256, %s2977_s0, %s2942_s14, %s2377_s2, %s2377_s2, %s2378_s11  }
 0xc9e PF: > { %p2144_p12 = scmp.ge.s32.totalorder %s2360_s24, 2  ;;  %s1558_s29 = sand.u32 1, %s2348_s21  }
 0xc9f   : > { %p3062_p13 = scmp.ne.s32.totalorder %s3057_s8, 0  ;;  %s1559_s13 = scalar_lea.sflag [#allocation4], %s1558_s29 }
 0xca1   : > { %p2133_p0 = pnand %p2144_p12, %p3062_p13 }
 0xca3   : > { %p2134_p1 = pneg %p2133_p0 }
 0xca5   : > { %2339 = dma.done.wait (%p2134_p1), %s1559_s13, 256  }
 0xca6   : > { %2341 = vsyncadd (%p2134_p1), %s1559_s13, 4294967040  ;;  %s3063_s7 = sadd.s32 4294967294, %s2360_s24  }
 0xca7   : > { %s1567_s15 = sand.u32 1, %s3063_s7  }
 0xca8   : > { %s1568_s20 = scalar_lea.sflag [#allocation7], %s1567_s15 }
 0xca9   : > { %2343 = dma.done.wait (%p2134_p1), %s1568_s20, 288  }
 0xcaa   : > { %2345 = vsyncadd (%p2134_p1), %s1568_s20, 4294967008  ;;  %p21_p5 = scmp.ge.s32.totalorder %s2440_s27, 4   ;;  %s3064_s21 = smov %s2352_s22 }
 0xcab   : > { %s3065_s22 = smov %s2356_s23  ;;  %s3066_s23 = smov %s2453_s30 }
 0xcac   : > { %s3067_s24 = smov %s2440_s27  ;;  %23 = sbr.rel (!%p21_p5) target bundleno = 10 (0xa), region = 134 }
 0xcb1   :  { %1582 = vsyncpa [#allocation3], 1 }
 0xcb2   :  { %1584 = vsyncpa [#allocation3 + $0x1], 1 }
 0xcb3   :  { %1585 = vsyncpa [#allocation4], 1 }
 0xcb4   :  { %1587 = vsyncpa [#allocation4 + $0x1], 1 }
 0xcb5   :  { %1588 = vsyncpa [#allocation7], 1 }
 0xcb6   :  { %1590 = vsyncpa [#allocation7 + $0x1], 1 }

</bundles_post_ra>
